<compile_context>
chip_gen: v6e
topology: v6e:2x2x1
jax: 0.10.0
libtpu: 0.0.40
codegen_flags: <defaults>
</compile_context>

<pallas_src>
import math

import jax
import jax.numpy as jnp
from jax.experimental import pallas as pl
from jax.experimental.pallas import tpu as pltpu

# Candidate lane widths for the 2D (rows, W) view, widest first.
_LANE_WIDTHS = (4096, 2048, 1024, 512, 256, 128)
# Target VMEM bytes per (single) block buffer: ~4 MiB (plateau of the
# mem-bound roofline on v5e/v6e/v7x; 2x buffers x (in+out) = 16 MiB).
_TARGET_BLOCK_BYTES = 4 * 1024 * 1024
# Below this element count, a fused XLA multiply beats any pallas_call.
_SMALL_TOTAL = 1 << 16  # 65536 elements
_VMEM_LIMIT_BYTES = 32 * 1024 * 1024


def _zeroed_ray_bender_kernel(pos_ref, out_ref):
    # Elementwise VPU op: multiply by 0.0 in the input dtype. Keeps
    # NaN/Inf -> NaN and -x -> -0.0 behavior identical to `x * 0.0`.
    out_ref[...] = pos_ref[...] * jnp.asarray(0.0, dtype=pos_ref.dtype)


def zeroed_ray_bender_forward(ray_positions, deformation=None, video_indexes=None):
    """Pallas implementation of ZeroedRayBender.forward.

    :param ray_positions: (..., 3) array of ray positions
    :param deformation: (..., deformation_features_count) array (unused)
    :param video_indexes: (...) int array (unused)
    :return: (..., 3) array of position displacements (all zeros, with
             NaN/Inf propagation matching `ray_positions * 0.0`)
    """
    del deformation, video_indexes  # unused, matching the PyTorch module

    orig_shape = ray_positions.shape
    dtype = ray_positions.dtype
    total = math.prod(orig_shape) if orig_shape else 1
    itemsize = jnp.dtype(dtype).itemsize
    zero = jnp.asarray(0.0, dtype=dtype)

    # Pick the widest lane width that exactly divides the flat element count
    # (keeps the reshape a free bitcast -> no pad / slice copies).
    lane_width = next((w for w in _LANE_WIDTHS if total % w == 0), None)

    # Small / ragged / empty bypass: fused XLA elementwise multiply is strictly
    # faster than any kernel launch here and has identical semantics.
    if total == 0 or total < _SMALL_TOTAL or lane_width is None:
        return ray_positions * zero

    rows = total // lane_width
    x2d = ray_positions.reshape(rows, lane_width)  # free bitcast (row-major)

    # Sublane packing: 8 rows per vreg for 4-byte dtypes, 16 for 2-byte,
    # 32 for 1-byte. Block rows must be a multiple of this (or full extent).
    sublane_pack = 8 * max(1, 4 // itemsize)
    tile_rows = _TARGET_BLOCK_BYTES // (lane_width * itemsize)
    tile_rows = max(sublane_pack, (tile_rows // sublane_pack) * sublane_pack)
    if rows <= tile_rows:
        tile_rows = rows  # full-extent block is always a legal block shape

    grid = (pl.cdiv(rows, tile_rows),)

    out2d = pl.pallas_call(
        _zeroed_ray_bender_kernel,
        out_shape=jax.ShapeDtypeStruct((rows, lane_width), dtype),
        grid_spec=pl.GridSpec(
            grid=grid,
            in_specs=[pl.BlockSpec((tile_rows, lane_width), lambda i: (i, 0))],
            out_specs=pl.BlockSpec((tile_rows, lane_width), lambda i: (i, 0)),
        ),
        compiler_params=pltpu.CompilerParams(
            dimension_semantics=("parallel",),
            vmem_limit_bytes=_VMEM_LIMIT_BYTES,
        ),
        cost_estimate=pl.CostEstimate(
            flops=total,
            transcendentals=0,
            bytes_accessed=2 * total * itemsize,
        ),
    )(x2d)

    return out2d.reshape(orig_shape)  # free bitcast


if __name__ == "__main__":
    key = jax.random.PRNGKey(0)
    k1, k2, k3 = jax.random.split(key, 3)

    # Small module-style demo (batch=2, n_rays=16, 3D positions): takes the
    # fused-XLA small-input bypass.
    batch, n_rays, deformation_features_count = 2, 16, 8
    ray_positions = jax.random.normal(k1, (batch, n_rays, 3), dtype=jnp.float32)
    deformation = jax.random.normal(
        k2, (batch, n_rays, deformation_features_count), dtype=jnp.float32
    )
    video_indexes = jnp.zeros((batch, n_rays), dtype=jnp.int32)

    out = zeroed_ray_bender_forward(ray_positions, deformation, video_indexes)
    out = jax.block_until_ready(out)
    assert out.shape == ray_positions.shape
    assert out.dtype == ray_positions.dtype
    assert bool(jnp.all(out == 0.0))

    # Larger shape that exercises the Pallas fast path:
    # 256*128*3 = 98304 elements, divisible by 4096 -> (24, 4096) lane-dense view.
    big_positions = jax.random.normal(k3, (256, 128, 3), dtype=jnp.float32)
    big_positions = big_positions.at[0, 0, 0].set(jnp.nan)
    big_positions = big_positions.at[1, 2, 1].set(jnp.inf)

    out_big = zeroed_ray_bender_forward(big_positions)
    out_big = jax.block_until_ready(out_big)
    assert out_big.shape == big_positions.shape
    assert out_big.dtype == big_positions.dtype
    assert bool(jnp.isnan(out_big[0, 0, 0]))   # nan * 0.0 -> nan
    assert bool(jnp.isnan(out_big[1, 2, 1]))   # inf * 0.0 -> nan
    finite_mask = jnp.isfinite(big_positions)
    assert bool(jnp.all(jnp.where(finite_mask, out_big == 0.0, True)))

    print("KERNEL_OK")
</pallas_src>

<mosaic_0001>
module attributes {stable_mosaic.version = 11 : i64} {
  func.func @_zeroed_ray_bender_kernel(%arg0: i32, %arg1: memref<24x4096xf32, #tpu.memory_space<vmem>>, %arg2: memref<24x4096xf32, #tpu.memory_space<vmem>>) attributes {dimension_semantics = [#tpu.dimension_semantics<parallel>], iteration_bounds = array<i64: 1>, scalar_prefetch = 0 : i64, scratch_operands = 0 : i64, tpu.core_type = #tpu.core_type<tc>, window_params = [{transform_indices = @transform_0, window_bounds = array<i64: 24, 4096>}, {transform_indices = @transform_1, window_bounds = array<i64: 24, 4096>}]} {
    %c0 = arith.constant 0 : index
    %c0_0 = arith.constant 0 : index
    %0 = vector.load %arg1[%c0, %c0_0] : memref<24x4096xf32, #tpu.memory_space<vmem>>, vector<24x4096xf32>
    %cst = arith.constant 0.000000e+00 : f32
    %1 = vector.broadcast %cst : f32 to vector<24x4096xf32>
    %2 = arith.mulf %0, %1 : vector<24x4096xf32>
    %c0_1 = arith.constant 0 : index
    %c0_2 = arith.constant 0 : index
    %3 = vector.load %arg2[%c0_1, %c0_2] : memref<24x4096xf32, #tpu.memory_space<vmem>>, vector<24x4096xf32>
    tpu.vector_store %arg2[%c0_1, %c0_2], %2 {strides = array<i32>} : memref<24x4096xf32, #tpu.memory_space<vmem>>, vector<24x4096xf32>,
    return
  }
  func.func @transform_0(%arg0: i32) -> (i32, i32) {
    %c0_i32 = arith.constant 0 : i32
    %c0_i32_0 = arith.constant 0 : i32
    return %arg0, %c0_i32 : i32, i32
  }
  func.func @transform_1(%arg0: i32) -> (i32, i32) {
    %c0_i32 = arith.constant 0 : i32
    %c0_i32_0 = arith.constant 0 : i32
    return %arg0, %c0_i32 : i32, i32
  }
}

</mosaic_0001>

<bundles_post_ra>
// kernel: tpu_custom_call.1
= control target key start
LH: loop header
LB: loop body
LE: loop exit
PB: predicated region body
PF: predicated region fallthrough
CT: control target
= control target key end

     0   :  { %6 = vsyncpa [#allocation3], 0  ;;  %s405_s0 = inlined_call_operand.hbm [shape: f32[24,4096], index: 0, kind: input, shape index: {}]   ;;  %s406_s1 = inlined_call_operand.hbm [shape: f32[24,4096], index: 1, kind: output, shape index: {}]  }
   0x1   :  { %7 = vsyncpa [#allocation4], 0  ;;  %s376_s6 = smov [#allocation2]  }
   0x2   :  { %s13_s7 = sshll.u32 %s376_s6, 4  ;;  %s14_s7 = int_to_ptr.vmem [resolvable:$true] %s13_s7 }
   0x3   :  { %s340_s8 = scalar_lea.vmem %s14_s7, 12288  ;;  %p345_p1 = scmp.lt.s32.totalorder %s14_s7, %s14_s7 }
   0x4   :  { %p341_p0 = scmp.ne.s32.totalorder %s14_s7, %s340_s8  ;;  %p346_p2 = scmp.lt.s32.totalorder %s340_s8, %s340_s8 }
   0x6   :  { %p347_p3 = por %p346_p2, %p345_p1 }
   0x8   :  { %p348_p4 = pnand %p347_p3, %p341_p0 }
   0xa   :  { %351 = shalt.err (!%p348_p4)
}
   0xb   :  { %s377_s9 = smov 4096   ;;  %s378_s10 = smov 256  }
   0xc   :  { %19 = dma.hbm_to_vmem [thread:$0]  %s405_s0, 12288, %s14_s7, [#allocation3], %s377_s9, %s377_s9, %s378_s10  }
   0xd   :  { %372 = dma.done.wait [#allocation3], 12288  }
   0xe   :  { %373 = vsyncadd [#allocation3], 4294955008  ;;  %v23_v0 = vld [vmem:[#allocation2] sm:$0xff]  ;;  %v24_v1 = vld [vmem:[#allocation2 + $0x8] sm:$0xff]  ;;  %s379_s13 = smov [#allocation5]  }
   0xf   :  { %v25_v2 = vld [vmem:[#allocation2 + $0x10] sm:$0xff]  ;;  %s396_s14 = sshll.u32 %s379_s13, 4  ;;  %v119_v3 = vmul.f32 0.0, %v23_v0  ;;  %v120_v4 = vmul.f32 0.0, %v24_v1  ;;  %v26_v6 = vld [vmem:[#allocation2 + $0x18] sm:$0xff]  ;;  %v27_v7 = vld [vmem:[#allocation2 + $0x20] sm:$0xff]  ;;  %s317_s14 = int_to_ptr.vmem [resolvable:$true] %s396_s14 }
  0x10   :  { %v121_v5 = vmul.f32 0.0, %v25_v2  ;;  %v28_v8 = vld [vmem:[#allocation2 + $0x28] sm:$0xff]  ;;  %v122_v9 = vmul.f32 0.0, %v26_v6  ;;  %v123_v10 = vmul.f32 0.0, %v27_v7  ;;  %v29_v12 = vld [vmem:[#allocation2 + $0x30] sm:$0xff]  ;;  %v30_v13 = vld [vmem:[#allocation2 + $0x38] sm:$0xff]  ;;  %p357_p6 = scmp.lt.s32.totalorder %s317_s14, %s317_s14 }
  0x11   :  { %v124_v11 = vmul.f32 0.0, %v28_v8  ;;  %v31_v14 = vld [vmem:[#allocation2 + $0x40] sm:$0xff]  ;;  %215 = vst [vmem:[#allocation5] sm:$0xff] %v119_v3  ;;  %216 = vst [vmem:[#allocation5 + $0x8] sm:$0xff] %v120_v4  ;;  %v125_v15 = vmul.f32 0.0, %v29_v12  ;;  %v126_v16 = vmul.f32 0.0, %v30_v13 }
  0x12   :  { %217 = vst [vmem:[#allocation5 + $0x10] sm:$0xff] %v121_v5  ;;  %v127_v17 = vmul.f32 0.0, %v31_v14  ;;  %v32_v18 = vld [vmem:[#allocation2 + $0x48] sm:$0xff]  ;;  %v33_v19 = vld [vmem:[#allocation2 + $0x50] sm:$0xff]  ;;  %v34_v20 = vld [vmem:[#allocation2 + $0x58] sm:$0xff]  ;;  %s352_s0 = scalar_lea.vmem %s317_s14, 12288 }
  0x13   :  { %218 = vst [vmem:[#allocation5 + $0x18] sm:$0xff] %v122_v9  ;;  %219 = vst [vmem:[#allocation5 + $0x20] sm:$0xff] %v123_v10  ;;  %v128_v21 = vmul.f32 0.0, %v32_v18  ;;  %v129_v22 = vmul.f32 0.0, %v33_v19  ;;  %v130_v23 = vmul.f32 0.0, %v34_v20  ;;  %v35_v24 = vld [vmem:[#allocation2 + $0x60] sm:$0xff]  ;;  %p353_p5 = scmp.ne.s32.totalorder %s317_s14, %s352_s0  ;;  %p358_p7 = scmp.lt.s32.totalorder %s352_s0, %s352_s0 }
  0x14   :  { %220 = vst [vmem:[#allocation5 + $0x28] sm:$0xff] %v124_v11  ;;  %v36_v25 = vld [vmem:[#allocation2 + $0x68] sm:$0xff]  ;;  %v37_v26 = vld [vmem:[#allocation2 + $0x70] sm:$0xff]  ;;  %221 = vst [vmem:[#allocation5 + $0x30] sm:$0xff] %v125_v15  ;;  %v131_v27 = vmul.f32 0.0, %v35_v24 }
  0x15   :  { %222 = vst [vmem:[#allocation5 + $0x38] sm:$0xff] %v126_v16  ;;  %223 = vst [vmem:[#allocation5 + $0x40] sm:$0xff] %v127_v17  ;;  %v132_v28 = vmul.f32 0.0, %v36_v25  ;;  %v133_v29 = vmul.f32 0.0, %v37_v26  ;;  %v38_v30 = vld [vmem:[#allocation2 + $0x78] sm:$0xff]  ;;  %v39_v31 = vld [vmem:[#allocation2 + $0x80] sm:$0xff]  ;;  %p359_p8 = por %p358_p7, %p357_p6 }
  0x16   :  { %v40_v32 = vld [vmem:[#allocation2 + $0x88] sm:$0xff]  ;;  %224 = vst [vmem:[#allocation5 + $0x48] sm:$0xff] %v128_v21  ;;  %225 = vst [vmem:[#allocation5 + $0x50] sm:$0xff] %v129_v22  ;;  %v134_v33 = vmul.f32 0.0, %v38_v30  ;;  %v135_v34 = vmul.f32 0.0, %v39_v31  ;;  %v41_v36 = vld [vmem:[#allocation2 + $0x90] sm:$0xff] }
  0x17   :  { %226 = vst [vmem:[#allocation5 + $0x58] sm:$0xff] %v130_v23  ;;  %v136_v35 = vmul.f32 0.0, %v40_v32  ;;  %v42_v37 = vld [vmem:[#allocation2 + $0x98] sm:$0xff]  ;;  %v43_v38 = vld [vmem:[#allocation2 + $0xa0] sm:$0xff]  ;;  %227 = vst [vmem:[#allocation5 + $0x60] sm:$0xff] %v131_v27  ;;  %v137_v39 = vmul.f32 0.0, %v41_v36  ;;  %p360_p9 = pnand %p359_p8, %p353_p5 }
  0x18   :  { %228 = vst [vmem:[#allocation5 + $0x68] sm:$0xff] %v132_v28  ;;  %229 = vst [vmem:[#allocation5 + $0x70] sm:$0xff] %v133_v29  ;;  %v138_v40 = vmul.f32 0.0, %v42_v37  ;;  %v139_v41 = vmul.f32 0.0, %v43_v38  ;;  %v44_v42 = vld [vmem:[#allocation2 + $0xa8] sm:$0xff]  ;;  %v45_v43 = vld [vmem:[#allocation2 + $0xb0] sm:$0xff] }
  0x19   :  { %v46_v44 = vld [vmem:[#allocation2 + $0xb8] sm:$0xff]  ;;  %230 = vst [vmem:[#allocation5 + $0x78] sm:$0xff] %v134_v33  ;;  %231 = vst [vmem:[#allocation5 + $0x80] sm:$0xff] %v135_v34  ;;  %v140_v45 = vmul.f32 0.0, %v44_v42  ;;  %v141_v46 = vmul.f32 0.0, %v45_v43  ;;  %v47_v48 = vld [vmem:[#allocation2 + $0xc0] sm:$0xff] }
  0x1a   :  { %232 = vst [vmem:[#allocation5 + $0x88] sm:$0xff] %v136_v35  ;;  %v142_v47 = vmul.f32 0.0, %v46_v44  ;;  %v48_v49 = vld [vmem:[#allocation2 + $0xc8] sm:$0xff]  ;;  %v49_v50 = vld [vmem:[#allocation2 + $0xd0] sm:$0xff]  ;;  %233 = vst [vmem:[#allocation5 + $0x90] sm:$0xff] %v137_v39  ;;  %v143_v51 = vmul.f32 0.0, %v47_v48 }
  0x1b   :  { %234 = vst [vmem:[#allocation5 + $0x98] sm:$0xff] %v138_v40  ;;  %235 = vst [vmem:[#allocation5 + $0xa0] sm:$0xff] %v139_v41  ;;  %v144_v52 = vmul.f32 0.0, %v48_v49  ;;  %v145_v53 = vmul.f32 0.0, %v49_v50  ;;  %v50_v54 = vld [vmem:[#allocation2 + $0xd8] sm:$0xff]  ;;  %v51_v55 = vld [vmem:[#allocation2 + $0xe0] sm:$0xff] }
  0x1c   :  { %v52_v56 = vld [vmem:[#allocation2 + $0xe8] sm:$0xff]  ;;  %236 = vst [vmem:[#allocation5 + $0xa8] sm:$0xff] %v140_v45  ;;  %237 = vst [vmem:[#allocation5 + $0xb0] sm:$0xff] %v141_v46  ;;  %v146_v57 = vmul.f32 0.0, %v50_v54  ;;  %v147_v58 = vmul.f32 0.0, %v51_v55  ;;  %v53_v60 = vld [vmem:[#allocation2 + $0xf0] sm:$0xff] }
  0x1d   :  { %238 = vst [vmem:[#allocation5 + $0xb8] sm:$0xff] %v142_v47  ;;  %v148_v59 = vmul.f32 0.0, %v52_v56  ;;  %v54_v61 = vld [vmem:[#allocation2 + $0xf8] sm:$0xff]  ;;  %v55_v62 = vld [vmem:[#allocation2 + $0x100] sm:$0xff]  ;;  %239 = vst [vmem:[#allocation5 + $0xc0] sm:$0xff] %v143_v51  ;;  %v149_v63 = vmul.f32 0.0, %v53_v60 }
  0x1e   :  { %240 = vst [vmem:[#allocation5 + $0xc8] sm:$0xff] %v144_v52  ;;  %241 = vst [vmem:[#allocation5 + $0xd0] sm:$0xff] %v145_v53  ;;  %v150_v0 = vmul.f32 0.0, %v54_v61  ;;  %v151_v1 = vmul.f32 0.0, %v55_v62  ;;  %v56_v2 = vld [vmem:[#allocation2 + $0x108] sm:$0xff]  ;;  %v57_v3 = vld [vmem:[#allocation2 + $0x110] sm:$0xff] }
  0x1f   :  { %v58_v4 = vld [vmem:[#allocation2 + $0x118] sm:$0xff]  ;;  %242 = vst [vmem:[#allocation5 + $0xd8] sm:$0xff] %v146_v57  ;;  %243 = vst [vmem:[#allocation5 + $0xe0] sm:$0xff] %v147_v58  ;;  %v152_v5 = vmul.f32 0.0, %v56_v2  ;;  %v153_v6 = vmul.f32 0.0, %v57_v3  ;;  %v59_v8 = vld [vmem:[#allocation2 + $0x120] sm:$0xff] }
  0x20   :  { %244 = vst [vmem:[#allocation5 + $0xe8] sm:$0xff] %v148_v59  ;;  %v154_v7 = vmul.f32 0.0, %v58_v4  ;;  %v60_v9 = vld [vmem:[#allocation2 + $0x128] sm:$0xff]  ;;  %v61_v10 = vld [vmem:[#allocation2 + $0x130] sm:$0xff]  ;;  %245 = vst [vmem:[#allocation5 + $0xf0] sm:$0xff] %v149_v63  ;;  %v155_v11 = vmul.f32 0.0, %v59_v8 }
  0x21   :  { %246 = vst [vmem:[#allocation5 + $0xf8] sm:$0xff] %v150_v0  ;;  %247 = vst [vmem:[#allocation5 + $0x100] sm:$0xff] %v151_v1  ;;  %v156_v12 = vmul.f32 0.0, %v60_v9  ;;  %v157_v13 = vmul.f32 0.0, %v61_v10  ;;  %v62_v14 = vld [vmem:[#allocation2 + $0x138] sm:$0xff]  ;;  %v63_v15 = vld [vmem:[#allocation2 + $0x140] sm:$0xff] }
  0x22   :  { %v64_v16 = vld [vmem:[#allocation2 + $0x148] sm:$0xff]  ;;  %248 = vst [vmem:[#allocation5 + $0x108] sm:$0xff] %v152_v5  ;;  %249 = vst [vmem:[#allocation5 + $0x110] sm:$0xff] %v153_v6  ;;  %v158_v17 = vmul.f32 0.0, %v62_v14  ;;  %v159_v18 = vmul.f32 0.0, %v63_v15  ;;  %v65_v20 = vld [vmem:[#allocation2 + $0x150] sm:$0xff] }
  0x23   :  { %250 = vst [vmem:[#allocation5 + $0x118] sm:$0xff] %v154_v7  ;;  %v160_v19 = vmul.f32 0.0, %v64_v16  ;;  %v66_v21 = vld [vmem:[#allocation2 + $0x158] sm:$0xff]  ;;  %v67_v22 = vld [vmem:[#allocation2 + $0x160] sm:$0xff]  ;;  %251 = vst [vmem:[#allocation5 + $0x120] sm:$0xff] %v155_v11  ;;  %v161_v23 = vmul.f32 0.0, %v65_v20 }
  0x24   :  { %252 = vst [vmem:[#allocation5 + $0x128] sm:$0xff] %v156_v12  ;;  %253 = vst [vmem:[#allocation5 + $0x130] sm:$0xff] %v157_v13  ;;  %v162_v24 = vmul.f32 0.0, %v66_v21  ;;  %v163_v25 = vmul.f32 0.0, %v67_v22  ;;  %v68_v26 = vld [vmem:[#allocation2 + $0x168] sm:$0xff]  ;;  %v69_v27 = vld [vmem:[#allocation2 + $0x170] sm:$0xff] }
  0x25   :  { %v70_v28 = vld [vmem:[#allocation2 + $0x178] sm:$0xff]  ;;  %254 = vst [vmem:[#allocation5 + $0x138] sm:$0xff] %v158_v17  ;;  %255 = vst [vmem:[#allocation5 + $0x140] sm:$0xff] %v159_v18  ;;  %v164_v29 = vmul.f32 0.0, %v68_v26  ;;  %v165_v30 = vmul.f32 0.0, %v69_v27  ;;  %v71_v32 = vld [vmem:[#allocation2 + $0x180] sm:$0xff] }
  0x26   :  { %256 = vst [vmem:[#allocation5 + $0x148] sm:$0xff] %v160_v19  ;;  %v166_v31 = vmul.f32 0.0, %v70_v28  ;;  %v72_v33 = vld [vmem:[#allocation2 + $0x188] sm:$0xff]  ;;  %v73_v34 = vld [vmem:[#allocation2 + $0x190] sm:$0xff]  ;;  %257 = vst [vmem:[#allocation5 + $0x150] sm:$0xff] %v161_v23  ;;  %v167_v35 = vmul.f32 0.0, %v71_v32 }
  0x27   :  { %258 = vst [vmem:[#allocation5 + $0x158] sm:$0xff] %v162_v24  ;;  %259 = vst [vmem:[#allocation5 + $0x160] sm:$0xff] %v163_v25  ;;  %v168_v36 = vmul.f32 0.0, %v72_v33  ;;  %v169_v37 = vmul.f32 0.0, %v73_v34  ;;  %v74_v38 = vld [vmem:[#allocation2 + $0x198] sm:$0xff]  ;;  %v75_v39 = vld [vmem:[#allocation2 + $0x1a0] sm:$0xff] }
  0x28   :  { %v76_v40 = vld [vmem:[#allocation2 + $0x1a8] sm:$0xff]  ;;  %260 = vst [vmem:[#allocation5 + $0x168] sm:$0xff] %v164_v29  ;;  %261 = vst [vmem:[#allocation5 + $0x170] sm:$0xff] %v165_v30  ;;  %v170_v41 = vmul.f32 0.0, %v74_v38  ;;  %v171_v42 = vmul.f32 0.0, %v75_v39  ;;  %v77_v44 = vld [vmem:[#allocation2 + $0x1b0] sm:$0xff] }
  0x29   :  { %262 = vst [vmem:[#allocation5 + $0x178] sm:$0xff] %v166_v31  ;;  %v172_v43 = vmul.f32 0.0, %v76_v40  ;;  %v78_v45 = vld [vmem:[#allocation2 + $0x1b8] sm:$0xff]  ;;  %v79_v46 = vld [vmem:[#allocation2 + $0x1c0] sm:$0xff]  ;;  %263 = vst [vmem:[#allocation5 + $0x180] sm:$0xff] %v167_v35  ;;  %v173_v47 = vmul.f32 0.0, %v77_v44 }
  0x2a   :  { %264 = vst [vmem:[#allocation5 + $0x188] sm:$0xff] %v168_v36  ;;  %265 = vst [vmem:[#allocation5 + $0x190] sm:$0xff] %v169_v37  ;;  %v174_v48 = vmul.f32 0.0, %v78_v45  ;;  %v175_v49 = vmul.f32 0.0, %v79_v46  ;;  %v80_v50 = vld [vmem:[#allocation2 + $0x1c8] sm:$0xff]  ;;  %v81_v51 = vld [vmem:[#allocation2 + $0x1d0] sm:$0xff] }
  0x2b   :  { %v82_v52 = vld [vmem:[#allocation2 + $0x1d8] sm:$0xff]  ;;  %266 = vst [vmem:[#allocation5 + $0x198] sm:$0xff] %v170_v41  ;;  %267 = vst [vmem:[#allocation5 + $0x1a0] sm:$0xff] %v171_v42  ;;  %v176_v53 = vmul.f32 0.0, %v80_v50  ;;  %v177_v54 = vmul.f32 0.0, %v81_v51  ;;  %v83_v56 = vld [vmem:[#allocation2 + $0x1e0] sm:$0xff] }
  0x2c   :  { %268 = vst [vmem:[#allocation5 + $0x1a8] sm:$0xff] %v172_v43  ;;  %v178_v55 = vmul.f32 0.0, %v82_v52  ;;  %v84_v57 = vld [vmem:[#allocation2 + $0x1e8] sm:$0xff]  ;;  %v85_v58 = vld [vmem:[#allocation2 + $0x1f0] sm:$0xff]  ;;  %269 = vst [vmem:[#allocation5 + $0x1b0] sm:$0xff] %v173_v47  ;;  %v179_v59 = vmul.f32 0.0, %v83_v56 }
  0x2d   :  { %270 = vst [vmem:[#allocation5 + $0x1b8] sm:$0xff] %v174_v48  ;;  %271 = vst [vmem:[#allocation5 + $0x1c0] sm:$0xff] %v175_v49  ;;  %v180_v60 = vmul.f32 0.0, %v84_v57  ;;  %v181_v61 = vmul.f32 0.0, %v85_v58  ;;  %v86_v62 = vld [vmem:[#allocation2 + $0x1f8] sm:$0xff]  ;;  %v87_v63 = vld [vmem:[#allocation2 + $0x200] sm:$0xff] }
  0x2e   :  { %v88_v0 = vld [vmem:[#allocation2 + $0x208] sm:$0xff]  ;;  %272 = vst [vmem:[#allocation5 + $0x1c8] sm:$0xff] %v176_v53  ;;  %273 = vst [vmem:[#allocation5 + $0x1d0] sm:$0xff] %v177_v54  ;;  %v182_v1 = vmul.f32 0.0, %v86_v62  ;;  %v183_v2 = vmul.f32 0.0, %v87_v63  ;;  %v89_v4 = vld [vmem:[#allocation2 + $0x210] sm:$0xff] }
  0x2f   :  { %274 = vst [vmem:[#allocation5 + $0x1d8] sm:$0xff] %v178_v55  ;;  %v184_v3 = vmul.f32 0.0, %v88_v0  ;;  %v90_v5 = vld [vmem:[#allocation2 + $0x218] sm:$0xff]  ;;  %v91_v6 = vld [vmem:[#allocation2 + $0x220] sm:$0xff]  ;;  %275 = vst [vmem:[#allocation5 + $0x1e0] sm:$0xff] %v179_v59  ;;  %v185_v7 = vmul.f32 0.0, %v89_v4 }
  0x30   :  { %276 = vst [vmem:[#allocation5 + $0x1e8] sm:$0xff] %v180_v60  ;;  %277 = vst [vmem:[#allocation5 + $0x1f0] sm:$0xff] %v181_v61  ;;  %v186_v8 = vmul.f32 0.0, %v90_v5  ;;  %v187_v9 = vmul.f32 0.0, %v91_v6  ;;  %v92_v10 = vld [vmem:[#allocation2 + $0x228] sm:$0xff]  ;;  %v93_v11 = vld [vmem:[#allocation2 + $0x230] sm:$0xff] }
  0x31   :  { %v94_v12 = vld [vmem:[#allocation2 + $0x238] sm:$0xff]  ;;  %278 = vst [vmem:[#allocation5 + $0x1f8] sm:$0xff] %v182_v1  ;;  %279 = vst [vmem:[#allocation5 + $0x200] sm:$0xff] %v183_v2  ;;  %v188_v13 = vmul.f32 0.0, %v92_v10  ;;  %v189_v14 = vmul.f32 0.0, %v93_v11  ;;  %v95_v16 = vld [vmem:[#allocation2 + $0x240] sm:$0xff] }
  0x32   :  { %280 = vst [vmem:[#allocation5 + $0x208] sm:$0xff] %v184_v3  ;;  %v190_v15 = vmul.f32 0.0, %v94_v12  ;;  %v96_v17 = vld [vmem:[#allocation2 + $0x248] sm:$0xff]  ;;  %v97_v18 = vld [vmem:[#allocation2 + $0x250] sm:$0xff]  ;;  %281 = vst [vmem:[#allocation5 + $0x210] sm:$0xff] %v185_v7  ;;  %v191_v19 = vmul.f32 0.0, %v95_v16 }
  0x33   :  { %282 = vst [vmem:[#allocation5 + $0x218] sm:$0xff] %v186_v8  ;;  %283 = vst [vmem:[#allocation5 + $0x220] sm:$0xff] %v187_v9  ;;  %v192_v20 = vmul.f32 0.0, %v96_v17  ;;  %v193_v21 = vmul.f32 0.0, %v97_v18  ;;  %v98_v22 = vld [vmem:[#allocation2 + $0x258] sm:$0xff]  ;;  %v99_v23 = vld [vmem:[#allocation2 + $0x260] sm:$0xff] }
  0x34   :  { %v100_v24 = vld [vmem:[#allocation2 + $0x268] sm:$0xff]  ;;  %284 = vst [vmem:[#allocation5 + $0x228] sm:$0xff] %v188_v13  ;;  %285 = vst [vmem:[#allocation5 + $0x230] sm:$0xff] %v189_v14  ;;  %v194_v25 = vmul.f32 0.0, %v98_v22  ;;  %v195_v26 = vmul.f32 0.0, %v99_v23  ;;  %v101_v28 = vld [vmem:[#allocation2 + $0x270] sm:$0xff] }
  0x35   :  { %286 = vst [vmem:[#allocation5 + $0x238] sm:$0xff] %v190_v15  ;;  %v196_v27 = vmul.f32 0.0, %v100_v24  ;;  %v102_v29 = vld [vmem:[#allocation2 + $0x278] sm:$0xff]  ;;  %v103_v30 = vld [vmem:[#allocation2 + $0x280] sm:$0xff]  ;;  %287 = vst [vmem:[#allocation5 + $0x240] sm:$0xff] %v191_v19  ;;  %v197_v31 = vmul.f32 0.0, %v101_v28 }
  0x36   :  { %288 = vst [vmem:[#allocation5 + $0x248] sm:$0xff] %v192_v20  ;;  %289 = vst [vmem:[#allocation5 + $0x250] sm:$0xff] %v193_v21  ;;  %v198_v32 = vmul.f32 0.0, %v102_v29  ;;  %v199_v33 = vmul.f32 0.0, %v103_v30  ;;  %v104_v34 = vld [vmem:[#allocation2 + $0x288] sm:$0xff]  ;;  %v105_v35 = vld [vmem:[#allocation2 + $0x290] sm:$0xff] }
  0x37   :  { %v106_v36 = vld [vmem:[#allocation2 + $0x298] sm:$0xff]  ;;  %290 = vst [vmem:[#allocation5 + $0x258] sm:$0xff] %v194_v25  ;;  %291 = vst [vmem:[#allocation5 + $0x260] sm:$0xff] %v195_v26  ;;  %v200_v37 = vmul.f32 0.0, %v104_v34  ;;  %v201_v38 = vmul.f32 0.0, %v105_v35  ;;  %v107_v40 = vld [vmem:[#allocation2 + $0x2a0] sm:$0xff] }
  0x38   :  { %292 = vst [vmem:[#allocation5 + $0x268] sm:$0xff] %v196_v27  ;;  %v202_v39 = vmul.f32 0.0, %v106_v36  ;;  %v108_v41 = vld [vmem:[#allocation2 + $0x2a8] sm:$0xff]  ;;  %v109_v42 = vld [vmem:[#allocation2 + $0x2b0] sm:$0xff]  ;;  %293 = vst [vmem:[#allocation5 + $0x270] sm:$0xff] %v197_v31  ;;  %v203_v43 = vmul.f32 0.0, %v107_v40 }
  0x39   :  { %294 = vst [vmem:[#allocation5 + $0x278] sm:$0xff] %v198_v32  ;;  %295 = vst [vmem:[#allocation5 + $0x280] sm:$0xff] %v199_v33  ;;  %v204_v44 = vmul.f32 0.0, %v108_v41  ;;  %v205_v45 = vmul.f32 0.0, %v109_v42  ;;  %v110_v46 = vld [vmem:[#allocation2 + $0x2b8] sm:$0xff]  ;;  %v111_v47 = vld [vmem:[#allocation2 + $0x2c0] sm:$0xff] }
  0x3a   :  { %v112_v48 = vld [vmem:[#allocation2 + $0x2c8] sm:$0xff]  ;;  %296 = vst [vmem:[#allocation5 + $0x288] sm:$0xff] %v200_v37  ;;  %297 = vst [vmem:[#allocation5 + $0x290] sm:$0xff] %v201_v38  ;;  %v206_v49 = vmul.f32 0.0, %v110_v46  ;;  %v207_v50 = vmul.f32 0.0, %v111_v47  ;;  %v113_v52 = vld [vmem:[#allocation2 + $0x2d0] sm:$0xff] }
  0x3b   :  { %298 = vst [vmem:[#allocation5 + $0x298] sm:$0xff] %v202_v39  ;;  %v208_v51 = vmul.f32 0.0, %v112_v48  ;;  %v114_v53 = vld [vmem:[#allocation2 + $0x2d8] sm:$0xff]  ;;  %v115_v54 = vld [vmem:[#allocation2 + $0x2e0] sm:$0xff]  ;;  %299 = vst [vmem:[#allocation5 + $0x2a0] sm:$0xff] %v203_v43  ;;  %v209_v55 = vmul.f32 0.0, %v113_v52 }
  0x3c   :  { %300 = vst [vmem:[#allocation5 + $0x2a8] sm:$0xff] %v204_v44  ;;  %301 = vst [vmem:[#allocation5 + $0x2b0] sm:$0xff] %v205_v45  ;;  %v210_v56 = vmul.f32 0.0, %v114_v53  ;;  %v211_v57 = vmul.f32 0.0, %v115_v54  ;;  %v116_v58 = vld [vmem:[#allocation2 + $0x2e8] sm:$0xff]  ;;  %v117_v59 = vld [vmem:[#allocation2 + $0x2f0] sm:$0xff] }
  0x3d   :  { %v118_v60 = vld [vmem:[#allocation2 + $0x2f8] sm:$0xff]  ;;  %302 = vst [vmem:[#allocation5 + $0x2b8] sm:$0xff] %v206_v49  ;;  %303 = vst [vmem:[#allocation5 + $0x2c0] sm:$0xff] %v207_v50  ;;  %v212_v61 = vmul.f32 0.0, %v116_v58  ;;  %v213_v62 = vmul.f32 0.0, %v117_v59 }
  0x3e   :  { %304 = vst [vmem:[#allocation5 + $0x2c8] sm:$0xff] %v208_v51  ;;  %v214_v63 = vmul.f32 0.0, %v118_v60  ;;  %305 = vst [vmem:[#allocation5 + $0x2d0] sm:$0xff] %v209_v55 }
  0x3f   :  { %306 = vst [vmem:[#allocation5 + $0x2d8] sm:$0xff] %v210_v56  ;;  %307 = vst [vmem:[#allocation5 + $0x2e0] sm:$0xff] %v211_v57 }
  0x40   :  { %308 = vst [vmem:[#allocation5 + $0x2e8] sm:$0xff] %v212_v61  ;;  %309 = vst [vmem:[#allocation5 + $0x2f0] sm:$0xff] %v213_v62 }
  0x41   :  { %310 = vst [vmem:[#allocation5 + $0x2f8] sm:$0xff] %v214_v63 }
  0x42   :  { %363 = shalt.err (!%p360_p9)
}
  0x43   :  { %322 = dma.vmem_to_hbm [thread:$0]  %s317_s14, 12288, %s406_s1, [#allocation4], %s377_s9, %s377_s9, %s378_s10  }
  0x44   :  { %374 = dma.done.wait [#allocation4], 12288  }
  0x45   :  { %375 = vsyncadd [#allocation4], 4294955008 }
  0x46   :  { %326 = vsyncpa [#allocation3], 1 }
  0x47   :  { %327 = vsyncpa [#allocation4], 1 }

</bundles_post_ra>
